<compile_context>
chip_gen: v6e
topology: v6e:2x2x1
jax: 0.10.0
libtpu: 0.0.40
codegen_flags: <defaults>
</compile_context>

<pallas_src>
import jax
import jax.numpy as jnp
from jax import lax
from jax.experimental import pallas as pl
from jax.experimental.pallas import tpu as pltpu


# (L, N) x (L, D) -> (N, D): contract lhs dim 0 against rhs dim 0.
_CONTRACT_L = (((0,), (0,)), ((), ()))


def _embed_kernel(x_ref, w_ref, b_ref, o_ref):
    # x_ref: (1, L, N)  w_ref: (L, TD)  b_ref: (1, TD)  o_ref: (1, N, TD)
    y = lax.dot_general(x_ref[0], w_ref[...], _CONTRACT_L,
                        preferred_element_type=jnp.float32)        # (N, TD) f32
    o_ref[0] = (y + b_ref[...]).astype(o_ref.dtype)


def _embed_mask_kernel(x_ref, m_ref, w_ref, b_ref, o_ref):
    # x_ref: (1, L, N)  m_ref: (1, L, Nm)  w_ref: (L, TD)  b_ref: (1, TD)
    # o_ref: (1, N+Nm, TD): x-variates -> rows [:N], mask-variates -> rows [N:].
    n = x_ref.shape[2]
    w = w_ref[...]
    b = b_ref[...]
    yx = lax.dot_general(x_ref[0], w, _CONTRACT_L,
                         preferred_element_type=jnp.float32)       # (N, TD)
    ym = lax.dot_general(m_ref[0], w, _CONTRACT_L,
                         preferred_element_type=jnp.float32)       # (Nm, TD)
    o_ref[0, :n, :] = (yx + b).astype(o_ref.dtype)
    o_ref[0, n:, :] = (ym + b).astype(o_ref.dtype)


def _pick_d_tile(d_pad, max_tile):
    # d_pad is a multiple of 128; pick the largest lane-dense tile that divides it.
    for t in (512, 384, 256, 128):
        if t <= max_tile and d_pad % t == 0:
            return t
    return 128


def inverted_embedding(x, x_mask, weight, bias, *,
                       compute_dtype=jnp.bfloat16, d_tile_max=256):
    """InvertedEmbedding forward (eval mode).

    x:      [B, L, N] ; x_mask: [B, L, Nm] or None
    weight: [D, L] (torch nn.Linear layout) ; bias: [D]
    returns [B, N(+Nm), D] in x.dtype.
    """
    B, L, N = x.shape
    D = weight.shape[0]

    # Lane-dense output: pad d_model up to a multiple of 128 (avoids masked
    # vst.msk partial stores); sliced back at the end.  d_model=512 etc. is a no-op.
    d_pad = pl.cdiv(D, 128) * 128
    td = _pick_d_tile(d_pad, d_tile_max)

    # Weight is tiny; transposing it (not the activation) is cheap.
    w_t = jnp.transpose(weight).astype(compute_dtype)               # [L, D]
    b_p = bias.astype(jnp.float32)
    if d_pad != D:
        w_t = jnp.pad(w_t, ((0, 0), (0, d_pad - D)))
        b_p = jnp.pad(b_p, (0, d_pad - D))
    b2 = b_p.reshape(1, d_pad)

    x_c = x.astype(compute_dtype)
    out_dtype = x.dtype
    grid = (B, d_pad // td)

    # Constant index along the batch axis -> Pallas keeps these blocks resident.
    w_spec = pl.BlockSpec((L, td), lambda b, d: (0, d))
    b_spec = pl.BlockSpec((1, td), lambda b, d: (0, d))
    compiler_params = pltpu.CompilerParams(
        dimension_semantics=("parallel", "parallel"),
        vmem_limit_bytes=32 * 1024 * 1024)

    if x_mask is None:
        out = pl.pallas_call(
            _embed_kernel,
            out_shape=jax.ShapeDtypeStruct((B, N, d_pad), out_dtype),
            grid_spec=pltpu.PrefetchScalarGridSpec(
                num_scalar_prefetch=0,
                grid=grid,
                in_specs=[
                    pl.BlockSpec((1, L, N), lambda b, d: (b, 0, 0)),
                    w_spec,
                    b_spec,
                ],
                out_specs=pl.BlockSpec((1, N, td), lambda b, d: (b, 0, d)),
            ),
            compiler_params=compiler_params,
        )(x_c, w_t, b2)
    else:
        Nm = x_mask.shape[2]
        V = N + Nm
        m_c = x_mask.astype(compute_dtype)
        out = pl.pallas_call(
            _embed_mask_kernel,
            out_shape=jax.ShapeDtypeStruct((B, V, d_pad), out_dtype),
            grid_spec=pltpu.PrefetchScalarGridSpec(
                num_scalar_prefetch=0,
                grid=grid,
                in_specs=[
                    pl.BlockSpec((1, L, N), lambda b, d: (b, 0, 0)),
                    pl.BlockSpec((1, L, Nm), lambda b, d: (b, 0, 0)),
                    w_spec,
                    b_spec,
                ],
                out_specs=pl.BlockSpec((1, V, td), lambda b, d: (b, 0, d)),
            ),
            compiler_params=compiler_params,
        )(x_c, m_c, w_t, b2)

    if d_pad != D:
        out = out[:, :, :D]
    # TODO(synk): nn.Dropout(p=0.1) is identity in eval mode; training-mode
    # stochastic dropout would be fused into the kernel epilogue with
    # pltpu.prng_seed / pltpu.prng_random_bits (runs in VPU slack under the
    # MXU) and is intentionally not applied here.
    return out


if __name__ == "__main__":
    key = jax.random.PRNGKey(0)
    B, L, N, Nm, D = 2, 16, 4, 4, 32   # c_in = L = 16, d_model = 32

    k_x, k_m, k_w, k_b = jax.random.split(key, 4)
    x = jax.random.normal(k_x, (B, L, N), dtype=jnp.float32)
    x_mask = jax.random.normal(k_m, (B, L, Nm), dtype=jnp.float32)
    # Deterministic Linear(c_in=L, d_model=D) params (torch layout: [D, L], [D]).
    weight = jax.random.normal(k_w, (D, L), dtype=jnp.float32) * 0.1
    bias = jax.random.normal(k_b, (D,), dtype=jnp.float32) * 0.1

    # With mask path (mask variates appended along the variate dim).
    out_mask = jax.block_until_ready(inverted_embedding(x, x_mask, weight, bias))
    # No-mask path.
    out_nomask = jax.block_until_ready(inverted_embedding(x, None, weight, bias))

    # Plain-JAX reference of the PyTorch semantics (f32).
    xt = jnp.transpose(x, (0, 2, 1))
    mt = jnp.transpose(x_mask, (0, 2, 1))
    ref_mask = jnp.concatenate([xt, mt], axis=1) @ weight.T + bias
    ref_nomask = xt @ weight.T + bias

    assert out_mask.shape == (B, N + Nm, D)
    assert out_nomask.shape == (B, N, D)
    # bf16 inputs / f32 accumulation vs pure-f32 reference -> loose-ish tolerance.
    assert jnp.allclose(out_mask, ref_mask, atol=2e-2, rtol=2e-2), \
        float(jnp.max(jnp.abs(out_mask - ref_mask)))
    assert jnp.allclose(out_nomask, ref_nomask, atol=2e-2, rtol=2e-2), \
        float(jnp.max(jnp.abs(out_nomask - ref_nomask)))

    print("KERNEL_OK")
</pallas_src>

<mosaic_0001>
module attributes {stable_mosaic.version = 11 : i64} {
  func.func @_embed_mask_kernel(%arg0: i32, %arg1: i32, %arg2: memref<1x16x4xbf16, #tpu.memory_space<vmem>>, %arg3: memref<1x16x4xbf16, #tpu.memory_space<vmem>>, %arg4: memref<16x128xbf16, #tpu.memory_space<vmem>>, %arg5: memref<1x128xf32, #tpu.memory_space<vmem>>, %arg6: memref<1x8x128xf32, #tpu.memory_space<vmem>>) attributes {dimension_semantics = [#tpu.dimension_semantics<parallel>, #tpu.dimension_semantics<parallel>], iteration_bounds = array<i64: 2, 1>, scalar_prefetch = 0 : i64, scratch_operands = 0 : i64, tpu.core_type = #tpu.core_type<tc>, window_params = [{transform_indices = @transform_0, window_bounds = array<i64: 1, 16, 4>}, {transform_indices = @transform_1, window_bounds = array<i64: 1, 16, 4>}, {transform_indices = @transform_2, window_bounds = array<i64: 16, 128>}, {transform_indices = @transform_3, window_bounds = array<i64: 1, 128>}, {transform_indices = @transform_4, window_bounds = array<i64: 1, 8, 128>}]} {
    %c0 = arith.constant 0 : index
    %c0_0 = arith.constant 0 : index
    %0 = vector.load %arg4[%c0, %c0_0] : memref<16x128xbf16, #tpu.memory_space<vmem>>, vector<16x128xbf16>
    %c0_1 = arith.constant 0 : index
    %c0_2 = arith.constant 0 : index
    %1 = vector.load %arg5[%c0_1, %c0_2] : memref<1x128xf32, #tpu.memory_space<vmem>>, vector<1x128xf32>
    %c0_3 = arith.constant 0 : index
    %c0_4 = arith.constant 0 : index
    %c0_5 = arith.constant 0 : index
    %2 = vector.load %arg2[%c0_3, %c0_4, %c0_5] : memref<1x16x4xbf16, #tpu.memory_space<vmem>>, vector<1x16x4xbf16>
    %3 = vector.shape_cast %2 : vector<1x16x4xbf16> to vector<16x4xbf16>
    %cst = arith.constant dense<0.000000e+00> : vector<4x128xf32>
    %4 = tpu.matmul %3, %0, %cst {dimension_numbers = #tpu.dot_dimension_numbers<[0], [0], [1], [1], [0, 1, 1, 1], [], []>} : vector<16x4xbf16>, vector<16x128xbf16>, vector<4x128xf32> -> vector<4x128xf32>
    %c0_6 = arith.constant 0 : index
    %c0_7 = arith.constant 0 : index
    %c0_8 = arith.constant 0 : index
    %5 = vector.load %arg3[%c0_6, %c0_7, %c0_8] : memref<1x16x4xbf16, #tpu.memory_space<vmem>>, vector<1x16x4xbf16>
    %6 = vector.shape_cast %5 : vector<1x16x4xbf16> to vector<16x4xbf16>
    %cst_9 = arith.constant dense<0.000000e+00> : vector<4x128xf32>
    %7 = tpu.matmul %6, %0, %cst_9 {dimension_numbers = #tpu.dot_dimension_numbers<[0], [0], [1], [1], [0, 1, 1, 1], [], []>} : vector<16x4xbf16>, vector<16x128xbf16>, vector<4x128xf32> -> vector<4x128xf32>
    %8 = vector.broadcast %1 : vector<1x128xf32> to vector<4x128xf32>
    %9 = arith.addf %4, %8 : vector<4x128xf32>
    %c0_10 = arith.constant 0 : index
    %c0_11 = arith.constant 0 : index
    %c0_12 = arith.constant 0 : index
    %10 = vector.load %arg6[%c0_10, %c0_11, %c0_12] : memref<1x8x128xf32, #tpu.memory_space<vmem>>, vector<1x4x128xf32>
    %11 = vector.shape_cast %10 : vector<1x4x128xf32> to vector<4x128xf32>
    %12 = vector.shape_cast %9 : vector<4x128xf32> to vector<1x4x128xf32>
    tpu.vector_store %arg6[%c0_10, %c0_11, %c0_12], %12 {strides = array<i32>} : memref<1x8x128xf32, #tpu.memory_space<vmem>>, vector<1x4x128xf32>,
    %13 = vector.broadcast %1 : vector<1x128xf32> to vector<4x128xf32>
    %14 = arith.addf %7, %13 : vector<4x128xf32>
    %c0_13 = arith.constant 0 : index
    %c4 = arith.constant 4 : index
    %c0_14 = arith.constant 0 : index
    %15 = vector.load %arg6[%c0_13, %c4, %c0_14] : memref<1x8x128xf32, #tpu.memory_space<vmem>>, vector<1x4x128xf32>
    %16 = vector.shape_cast %15 : vector<1x4x128xf32> to vector<4x128xf32>
    %17 = vector.shape_cast %14 : vector<4x128xf32> to vector<1x4x128xf32>
    tpu.vector_store %arg6[%c0_13, %c4, %c0_14], %17 {strides = array<i32>} : memref<1x8x128xf32, #tpu.memory_space<vmem>>, vector<1x4x128xf32>,
    return
  }
  func.func @transform_0(%arg0: i32, %arg1: i32) -> (i32, i32, i32) {
    %c0_i32 = arith.constant 0 : i32
    %c0_i32_0 = arith.constant 0 : i32
    %c0_i32_1 = arith.constant 0 : i32
    return %arg0, %c0_i32, %c0_i32_0 : i32, i32, i32
  }
  func.func @transform_1(%arg0: i32, %arg1: i32) -> (i32, i32, i32) {
    %c0_i32 = arith.constant 0 : i32
    %c0_i32_0 = arith.constant 0 : i32
    %c0_i32_1 = arith.constant 0 : i32
    return %arg0, %c0_i32, %c0_i32_0 : i32, i32, i32
  }
  func.func @transform_2(%arg0: i32, %arg1: i32) -> (i32, i32) {
    %c0_i32 = arith.constant 0 : i32
    %c0_i32_0 = arith.constant 0 : i32
    return %c0_i32, %arg1 : i32, i32
  }
  func.func @transform_3(%arg0: i32, %arg1: i32) -> (i32, i32) {
    %c0_i32 = arith.constant 0 : i32
    %c0_i32_0 = arith.constant 0 : i32
    return %c0_i32, %arg1 : i32, i32
  }
  func.func @transform_4(%arg0: i32, %arg1: i32) -> (i32, i32, i32) {
    %c0_i32 = arith.constant 0 : i32
    %c0_i32_0 = arith.constant 0 : i32
    return %arg0, %c0_i32, %arg1 : i32, i32, i32
  }
}

</mosaic_0001>

<bundles_post_ra>
// kernel: tpu_custom_call.1
= control target key start
LH: loop header
LB: loop body
LE: loop exit
PB: predicated region body
PF: predicated region fallthrough
CT: control target
= control target key end

     0   :  { %9 = vsyncpa [#allocation3], 0  ;;  %s863_s0 = inlined_call_operand.vmem [shape: bf16[2,16,4], index: 0, kind: input, shape index: {}]   ;;  %s864_s1 = inlined_call_operand.vmem [shape: bf16[2,16,4], index: 1, kind: input, shape index: {}]   ;;  %s865_s2 = inlined_call_operand.vmem [shape: bf16[16,128], index: 2, kind: input, shape index: {}]   ;;  %s866_s3 = inlined_call_operand.vmem [shape: f32[1,128], index: 3, kind: input, shape index: {}]   ;;  %s867_s4 = inlined_call_operand.hbm [shape: f32[2,8,128], index: 4, kind: output, shape index: {}]  }
   0x1   :  { %11 = vsyncpa [#allocation3 + $0x1], 0  ;;  %s743_s15 = smov 0   ;;  %s745_s16 = smov 0  }
   0x2   :  { %s747_s17 = smov 0   ;;  %s749_s18 = smov 0  }
   0x3   :  { %s751_s19 = smov 0   ;;  %s753_s20 = smov 0  }
   0x4 LB: > { %s536_s21 = sadd.s32 4294967295, %s713_s20   ;;  %s537_s22 = sadd.s32 4294967294, %s713_s20   ;;  %s713_s20 = sphi %s753_s20, %s17_s20   ;;  %s709_s19 = sphi %s751_s19, %s874_s19   ;;  %s705_s18 = sphi %s749_s18, %s873_s18   ;;  %s701_s17 = sphi %s747_s17, %s872_s17   ;;  %s697_s16 = sphi %s745_s16, %s871_s16   ;;  %s693_s15 = sphi %s743_s15, %s870_s15  }
   0x5   : > { %s29_s23 = sadd.s32 1, %s709_s19  ;;  %s142_s24 = sadd.s32 1, %s701_s17 }
   0x6   : > { %p31_p0 = scmp.ge.s32.totalorder %s29_s23, 2  ;;  %p152_p1 = scmp.ne.s32.totalorder %s701_s17, %s697_s16 }
   0x7   : > { %p153_p2 = scmp.eq.s32.totalorder %s536_s21, 1  ;;  %p158_p3 = scmp.ne.s32.totalorder %s697_s16, %s693_s15 }
   0x8   : > { %s876_s23 = smov (%p31_p0, %s29_s23), 0  ;;  %p159_p5 = scmp.eq.s32.totalorder %s537_s22, 1 }
   0x9   : > { %p783_p4 = por %p153_p2, %p152_p1  ;;  %s137_s26 = ssub.s32 %s709_s19, %s876_s23 }
   0xa   : > { %p542_p6 = scmp.ge.s32.totalorder %s713_s20, 1  ;;  %p140_p7 = scmp.eq.s32.totalorder %s137_s26, 0 }
   0xb   : > { %p790_p8 = por %p159_p5, %p158_p3  ;;  %p206_p9 = scmp.lt.s32.totalorder %s713_s20, 3 }
   0xc   : > { %s796_s28 = scalar_select %p140_p7, %s701_s17, %s142_s24  }
   0xd   : > { %p207_p10 = pnand %p542_p6, %p206_p9 }
   0xe   : > { %p244_p11 = scmp.lt.s32.totalorder (!%p207_p10), %s705_s18, 1  ;;  %s241_s13 = sand.u32 (!%p207_p10), 1, %s697_s16  }
   0xf   : > { %210 = sbr.rel (%p207_p10) target bundleno = 337 (0x151), region = 36  ;;  %s543_s14 = sshll.u32 (!%p207_p10), %s241_s13, 3 }
  0x10   : > { %s555_s24 = sshll.u32 (!%p207_p10), %s705_s18, 7  ;;  %s243_s26 = scalar_lea.vmem (!%p207_p10), [#allocation2], %s543_s14 }
  0x11   : > { %s429_s29 = sshll.u32 (!%p207_p10), %s243_s26, 4  ;;  %s717_s8 = smov (!%p207_p10), [#allocation2]   ;;  %s819_s29 = int_to_ptr.vmem [resolvable:$true] %s429_s29 }
  0x12   : > { %s637_s7 = scalar_lea.vmem (!%p207_p10), %s819_s29, 128 }
  0x13   : > { %p638_p12 = scmp.ne.s32.totalorder (!%p207_p10), %s819_s29, %s637_s7 }
  0x14   : > { %v636_v0 = vld [vmem:[%s865_s2] sm:$0xff]   ;;  %v715_v1 = vmov 0.0   ;;  %s245_s5 = scalar_select %p244_p11, %s705_s18, 1  ;;  %vm716_vm0 = vmmov 0   ;;  %vm303_vm1 = vcmask 130048  }
  0x15   : > { %564 = vmatprep.subr.bf16.mxu0 %v715_v1  ;;  %570 = vmatprep.subr.bf16.mxu1 %v715_v1  ;;  %v548_v6 = vld [vmem:[%s866_s3] ss:$0 sm:$0xff]  ;;  %s415_s18 = scalar_lea.sflag [#allocation3], %s241_s13  ;;  %p639_p13 = pnand %p638_p12, %p783_p4 }
  0x16   : > { %565 = vmatpush3.bf16.msra.mxu0 %v636_v0  ;;  %566 = vmatprep.mubr.msk.bf16.mxu0 %vm716_vm0, %v715_v1  ;;  %s558_s6 = sshll.u32 %s245_s5, 3 }
  0x17   : > { %571 = vmatpush3.bf16.msra.mxu1 %v636_v0  ;;  %572 = vmatprep.mubr.msk.bf16.mxu1 %vm716_vm0, %v715_v1  ;;  %s248_s9 = scalar_lea.vmem %s863_s0, %s558_s6  ;;  %s253_s12 = scalar_lea.vmem %s864_s1, %s558_s6 }
  0x18   : > { %v634_v2 = vld [vmem:[%s248_s9] sm:$0xff]   ;;  %s817_s6 = scalar_lea.hbm %s867_s4, %s555_s24  ;;  %p640_p0 = pneg %p639_p13 }
  0x19   : > { %281 = vxpose.xlu0.c.b16.start.end [1/1] (short) (narrow) %v634_v2, 16  ;;  %v635_v3 = vld [vmem:[%s253_s12] sm:$0xff]   ;;  %s641_s9 = sshll.u32 %s717_s8, 4  ;;  %s642_s9 = int_to_ptr.vmem [resolvable:$false] %s641_s9 }
  0x1a   : > { %s643_s10 = scalar_lea.vmem %s642_s9, 256  ;;  %p644_p1 = scmp.lt.s32.totalorder %s819_s29, %s642_s9 }
  0x1b   : > { %p645_p2 = scmp.lt.s32.totalorder %s643_s10, %s637_s7 }
  0x1d   : > { %354 = vxpose.xlu0.c.b16.start.end [1/1] (short) (narrow) %v635_v3, 16  ;;  %p646_p3 = por %p645_p2, %p644_p1 }
  0x1f   : > { %p647_p5 = pnand %p646_p3, %p640_p0 }
  0x7b   : > { %v289_v4 = vpop.trf.xlu0 }
  0x7c   : > { %567 = vmatmul.mubr.msk.bf16.vlgmr.msra.gmra.mxu0 %vm303_vm1, %v289_v4 }
  0x7f   : > { %v362_v5 = vpop.trf.xlu0 }
  0x80   : > { %573 = vmatmul.mubr.msk.bf16.vlgmr.msra.gmra.mxu1 %vm303_vm1, %v362_v5 }
 0x13c   : > { %v341_v7 = vpop.f32.mrf.mxu0 }
 0x13d   : > { %v342_v8 = vadd.f32 %v548_v6, %v341_v7 }
 0x13e   : > { %v568_v9 = vpop.f32.mrf.mxu0 }
 0x13f   : > { %347 = vst [vmem:[%s243_s26] sm:$0xf] %v342_v8 }
 0x140   : > { %v344_v10 = vpop.f32.mrf.mxu0  ;;  %v407_v11 = vpop.f32.mrf.mxu1 }
 0x141   : > { %v408_v12 = vadd.f32 %v548_v6, %v407_v11 }
 0x142   : > { %v569_v13 = vpop.f32.mrf.mxu0  ;;  %v574_v14 = vpop.f32.mrf.mxu1 }
 0x143   : > { %413 = vst [vmem:[%s243_s26 + $0x4] sm:$0xf] %v408_v12 }
 0x144   : > { %v410_v15 = vpop.f32.mrf.mxu1 }
 0x145   : > { %650 = shalt.err (!%p647_p5)
}
 0x146   : > { %s651_s11 = scalar_lea.hbm %s817_s6, 128  ;;  %s655_s14 = scalar_lea.hbm %s867_s4, 256 }
 0x147   : > { %p652_p6 = scmp.ne.s32.totalorder %s817_s6, %s651_s11  ;;  %p656_p10 = scmp.lt.s32.totalorder %s817_s6, %s867_s4 }
 0x148   : > { %p657_p11 = scmp.lt.s32.totalorder %s655_s14, %s651_s11 }
 0x149   : > { %p653_p7 = pnand %p652_p6, %p783_p4 }
 0x14a   : > { %p658_p12 = por %p657_p11, %p656_p10 }
 0x14b   : > { %p654_p9 = pneg %p653_p7 }
 0x14d   : > { %p659_p13 = pnand %p658_p12, %p654_p9 }
 0x14f   : > { %662 = shalt.err (!%p659_p13)
}
 0x150   : > { %576 = dma.vmem_to_hbm [thread:$0]  (%p783_p4), %s819_s29, 128, %s817_s6, %s415_s18   ;;  %v575_v16 = vpop.f32.mrf.mxu1 }
 0x151 PF: > { %p582_p0 = scmp.ge.s32.totalorder %s713_s20, 2  ;;  %s441_s24 = sand.u32 1, %s693_s15  }
 0x152   : > { %s442_s26 = scalar_lea.sflag [#allocation3], %s441_s24 }
 0x153   : > { %p579_p1 = pnand %p582_p0, %p790_p8 }
 0x155   : > { %p580_p2 = pneg %p579_p1 }
 0x157   : > { %688 = dma.done.wait (%p580_p2), %s442_s26, 128  }
 0x158   : > { %690 = vsyncadd (%p580_p2), %s442_s26, 4294967168  ;;  %s17_s20 = sadd.s32 1, %s713_s20   ;;  %s870_s15 = smov %s697_s16 }
 0x159   : > { %p14_p3 = scmp.ge.s32.totalorder %s17_s20, 4   ;;  %s871_s16 = smov %s701_s17 }
 0x15a   : > { %s872_s17 = smov %s796_s28  ;;  %s873_s18 = smov %s709_s19 }
 0x15b   : > { %s874_s19 = smov %s876_s23  ;;  %16 = sbr.rel (!%p14_p3) target bundleno = 4 (0x4), region = 80 }
 0x160   :  { %447 = vsyncpa [#allocation3], 1 }
 0x161   :  { %449 = vsyncpa [#allocation3 + $0x1], 1 }

</bundles_post_ra>
